<compile_context>
chip_gen: v6e
topology: v6e:2x2x1
jax: 0.10.0
libtpu: 0.0.40
codegen_flags: <defaults>
</compile_context>

<pallas_src>
import functools

import jax
import jax.numpy as jnp
from jax.experimental import pallas as pl
from jax.experimental.pallas import tpu as pltpu

D_IN, D_HID, D_OUT = 784, 256, 10


# ---------------------------------------------------------------------------
# Kernel
# ---------------------------------------------------------------------------
def affine_collapse_kernel(x_ref, w_ref, b_ref, o_ref):
    """y = x @ W_eff + b_eff on one batch tile (bf16 MXU, f32 accumulation)."""
    # x may arrive as f32 (single HBM read) or bf16 (astype is then a no-op).
    x = x_ref[...].astype(jnp.bfloat16)                               # (TB, 784)
    acc = jnp.dot(x, w_ref[...], preferred_element_type=jnp.float32)  # (TB, 10) f32
    o_ref[...] = (acc + b_ref[...]).astype(o_ref.dtype)


# ---------------------------------------------------------------------------
# Parameter fusion (done once, outside the hot path)
# ---------------------------------------------------------------------------
def fuse_params(params):
    """Collapse the affine chain; W_eff cast to bf16 (VMEM-resident in kernel)."""
    w0, b0 = params["w0_t"], params["b0"]   # (784,256), (1,256)
    w2, b2 = params["w2_t"], params["b2"]   # (256, 10), (1, 10)
    w3, b3 = params["w3_t"], params["b3"]   # ( 10,784), (1,784)

    a = w0 @ w2                 # (784, 10)
    m = w3 @ a                  # ( 10, 10)
    w_eff = a @ m               # (784, 10)  == W0·W2·W3·W0·W2 (cheapest association)

    b_eff = b0 @ w2 + b2        # propagate biases through the chain (f32)
    b_eff = b_eff @ w3 + b3
    b_eff = b_eff @ w0 + b0
    b_eff = b_eff @ w2 + b2     # (1, 10)

    return dict(w_eff=w_eff.astype(jnp.bfloat16),   # (784, 10) bf16
                b_eff=b_eff)                        # (1,   10) f32


# ---------------------------------------------------------------------------
# Per-generation tile / VMEM budget
# ---------------------------------------------------------------------------
def _tpu_config():
    """Return (max_batch_tile, vmem_limit_bytes) tuned per TPU generation."""
    try:
        kind = jax.devices()[0].device_kind.lower()
    except Exception:  # pragma: no cover - defensive
        kind = ""
    if "v6" in kind:
        # v6e: 128 MiB physical VMEM; TB=4096 => ~35 MB of buffers.
        return 4096, 64 * 1024 * 1024
    if "v5 lite" in kind or "v5e" in kind or "v5litepod" in kind:
        # v5e: default scoped VMEM is 16 MiB; TB=2048 needs ~24 MiB.
        return 2048, 24 * 1024 * 1024
    # v7x (64 MiB/TC) and anything else: conservative budget with headroom.
    return 2048, 40 * 1024 * 1024


def _round_up(v, m):
    return ((v + m - 1) // m) * m


def _pick_tile(batch, max_tb):
    """Batch tile: big (amortize ~0.35us/step), but >=2 grid steps when large."""
    if batch < 8:
        return batch                       # block dim == full array dim: legal
    if batch >= 1024:
        tb = _round_up(-(-batch // 2), 8)  # at least 2 steps -> megacore shard
    else:
        tb = _round_up(batch, 8)
    return min(tb, max_tb)


# ---------------------------------------------------------------------------
# Forward wrapper (jitted; fused weights are ordinary device arrays)
# ---------------------------------------------------------------------------
@functools.partial(jax.jit, donate_argnums=())
def model_forward(x, fused):
    """x: (B, 784) f32 or bf16 -> (B, 10) f32."""
    B = x.shape[0]
    max_tb, vmem_limit = _tpu_config()
    tb = _pick_tile(B, max_tb)
    grid = (pl.cdiv(B, tb),)

    bytes_per_x_elem = jnp.dtype(x.dtype).itemsize
    cost = pl.CostEstimate(
        flops=2 * B * D_IN * D_OUT,
        transcendentals=0,
        bytes_accessed=(B * D_IN * bytes_per_x_elem   # x (dominant stream)
                        + D_IN * D_OUT * 2            # W_eff (bf16)
                        + D_OUT * 4                   # b_eff
                        + B * D_OUT * 4),             # output
    )

    return pl.pallas_call(
        affine_collapse_kernel,
        out_shape=jax.ShapeDtypeStruct((B, D_OUT), jnp.float32),
        grid_spec=pltpu.PrefetchScalarGridSpec(
            num_scalar_prefetch=0,
            grid=grid,
            in_specs=[
                pl.BlockSpec((tb, D_IN), lambda i: (i, 0)),    # x: tiled over batch
                pl.BlockSpec((D_IN, D_OUT), lambda i: (0, 0)),  # W_eff: VMEM-resident
                pl.BlockSpec((1, D_OUT), lambda i: (0, 0)),     # b_eff: VMEM-resident
            ],
            # Last dim (10) equals the full array dim -> legal narrow block;
            # no padded 128-lane output round trip.
            out_specs=pl.BlockSpec((tb, D_OUT), lambda i: (i, 0)),
        ),
        compiler_params=pltpu.CompilerParams(
            dimension_semantics=("parallel",),   # megacore-shard batch tiles
            vmem_limit_bytes=vmem_limit,
        ),
        cost_estimate=cost,
    )(x, fused["w_eff"], fused["b_eff"])


# ---------------------------------------------------------------------------
# Parameter init + references
# ---------------------------------------------------------------------------
def init_params(key):
    """Deterministic synthetic weights with PyTorch Linear init, pre-transposed."""
    ks = jax.random.split(key, 6)

    def linear(kw, kb, fan_in, fan_out):
        bound = 1.0 / jnp.sqrt(fan_in)
        # PyTorch stores weight as (out, in); we keep the transposed (in, out).
        w_t = jax.random.uniform(kw, (fan_in, fan_out), jnp.float32, -bound, bound)
        b = jax.random.uniform(kb, (1, fan_out), jnp.float32, -bound, bound)
        return w_t, b

    w0_t, b0 = linear(ks[0], ks[1], D_IN, D_HID)    # ML[0]: Linear(784, 256)
    w2_t, b2 = linear(ks[2], ks[3], D_HID, D_OUT)   # ML[2]: Linear(256, 10)
    w3_t, b3 = linear(ks[4], ks[5], D_OUT, D_IN)    # ML[3]: Linear(10, 784)
    return dict(w0_t=w0_t, b0=b0, w2_t=w2_t, b2=b2, w3_t=w3_t, b3=b3)


def model_forward_ref_f32(x, p):
    """Per-layer f32 reference (mirrors the PyTorch forward exactly)."""
    h = x @ p["w0_t"] + p["b0"]
    h = h @ p["w2_t"] + p["b2"]
    h = h @ p["w3_t"] + p["b3"]
    h = h @ p["w0_t"] + p["b0"]
    return h @ p["w2_t"] + p["b2"]


def model_forward_ref_matched(x, fused):
    """Plain-JAX reference with the same collapsed bf16 math as the kernel."""
    acc = jnp.dot(x.astype(jnp.bfloat16), fused["w_eff"],
                  preferred_element_type=jnp.float32)
    return acc + fused["b_eff"]


# ---------------------------------------------------------------------------
# Demo / self-test
# ---------------------------------------------------------------------------
if __name__ == "__main__":
    key = jax.random.PRNGKey(0)
    k_x, k_p = jax.random.split(key)

    B = 8
    x = jax.random.normal(k_x, (B, D_IN), dtype=jnp.float32)
    params = init_params(k_p)
    fused = fuse_params(params)          # computed once, outside the hot path

    out = model_forward(x, fused)
    out = jax.block_until_ready(out)
    assert out.shape == (B, D_OUT), out.shape

    # 1) Tight check vs a reference using identical collapsed bf16/f32 math.
    ref_matched = model_forward_ref_matched(x, fused)
    assert jnp.allclose(out, ref_matched, atol=1e-3, rtol=1e-3), \
        "mismatch vs matched-math reference"

    # 2) Semantic check vs the per-layer f32 chain (bf16 cast + affine collapse
    #    change rounding slightly, hence the looser tolerance).
    ref_f32 = model_forward_ref_f32(x, params)
    assert jnp.allclose(out, ref_f32, atol=2e-2, rtol=2e-2), \
        "mismatch vs per-layer f32 reference"

    print("KERNEL_OK")
</pallas_src>

<mosaic_0001>
module attributes {stable_mosaic.version = 11 : i64} {
  func.func @affine_collapse_kernel(%arg0: i32, %arg1: memref<8x784xf32, #tpu.memory_space<vmem>>, %arg2: memref<784x10xbf16, #tpu.memory_space<vmem>>, %arg3: memref<1x10xf32, #tpu.memory_space<vmem>>, %arg4: memref<8x10xf32, #tpu.memory_space<vmem>>) attributes {dimension_semantics = [#tpu.dimension_semantics<parallel>], iteration_bounds = array<i64: 1>, scalar_prefetch = 0 : i64, scratch_operands = 0 : i64, tpu.core_type = #tpu.core_type<tc>, window_params = [{transform_indices = @transform_0, window_bounds = array<i64: 8, 784>}, {pipeline_mode = #tpu.pipeline_mode<synchronous>, transform_indices = @transform_1, window_bounds = array<i64: 784, 10>}, {pipeline_mode = #tpu.pipeline_mode<synchronous>, transform_indices = @transform_2, window_bounds = array<i64: 1, 10>}, {transform_indices = @transform_3, window_bounds = array<i64: 8, 10>}]} {
    %c0 = arith.constant 0 : index
    %c0_0 = arith.constant 0 : index
    %0 = vector.load %arg1[%c0, %c0_0] : memref<8x784xf32, #tpu.memory_space<vmem>>, vector<8x784xf32>
    %1 = arith.truncf %0 : vector<8x784xf32> to vector<8x784xbf16>
    %c0_1 = arith.constant 0 : index
    %c0_2 = arith.constant 0 : index
    %2 = vector.load %arg2[%c0_1, %c0_2] : memref<784x10xbf16, #tpu.memory_space<vmem>>, vector<784x10xbf16>
    %cst = arith.constant dense<0.000000e+00> : vector<8x10xf32>
    %3 = tpu.matmul %1, %2, %cst {dimension_numbers = #tpu.dot_dimension_numbers<[1], [0], [0], [1], [0, 0, 1, 1], [], []>} : vector<8x784xbf16>, vector<784x10xbf16>, vector<8x10xf32> -> vector<8x10xf32>
    %c0_3 = arith.constant 0 : index
    %c0_4 = arith.constant 0 : index
    %4 = vector.load %arg3[%c0_3, %c0_4] : memref<1x10xf32, #tpu.memory_space<vmem>>, vector<1x10xf32>
    %5 = vector.broadcast %4 : vector<1x10xf32> to vector<8x10xf32>
    %6 = arith.addf %3, %5 : vector<8x10xf32>
    %c0_5 = arith.constant 0 : index
    %c0_6 = arith.constant 0 : index
    %7 = vector.load %arg4[%c0_5, %c0_6] : memref<8x10xf32, #tpu.memory_space<vmem>>, vector<8x10xf32>
    tpu.vector_store %arg4[%c0_5, %c0_6], %6 {strides = array<i32>} : memref<8x10xf32, #tpu.memory_space<vmem>>, vector<8x10xf32>,
    return
  }
  func.func @transform_0(%arg0: i32) -> (i32, i32) {
    %c0_i32 = arith.constant 0 : i32
    %c0_i32_0 = arith.constant 0 : i32
    return %arg0, %c0_i32 : i32, i32
  }
  func.func @transform_1(%arg0: i32) -> (i32, i32) {
    %c0_i32 = arith.constant 0 : i32
    %c0_i32_0 = arith.constant 0 : i32
    %c0_i32_1 = arith.constant 0 : i32
    return %c0_i32, %c0_i32_0 : i32, i32
  }
  func.func @transform_2(%arg0: i32) -> (i32, i32) {
    %c0_i32 = arith.constant 0 : i32
    %c0_i32_0 = arith.constant 0 : i32
    %c0_i32_1 = arith.constant 0 : i32
    return %c0_i32, %c0_i32_0 : i32, i32
  }
  func.func @transform_3(%arg0: i32) -> (i32, i32) {
    %c0_i32 = arith.constant 0 : i32
    %c0_i32_0 = arith.constant 0 : i32
    return %arg0, %c0_i32 : i32, i32
  }
}

</mosaic_0001>

<bundles_post_ra>
// kernel: model_forward.1
= control target key start
LH: loop header
LB: loop body
LE: loop exit
PB: predicated region body
PF: predicated region fallthrough
CT: control target
= control target key end

     0   :  { %v808_v44 = vmov 0.0   ;;  %vm809_vm0 = vmmov 0   ;;  %vm429_vm1 = vcmask 130048   ;;  %s1005_s0 = inlined_call_operand.vmem [shape: f32[8,784], index: 0, kind: input, shape index: {}]   ;;  %s1006_s1 = inlined_call_operand.vmem [shape: bf16[784,10], index: 1, kind: input, shape index: {}]   ;;  %s1007_s2 = inlined_call_operand.vmem [shape: f32[1,10], index: 2, kind: input, shape index: {}]   ;;  %s1008_s3 = inlined_call_operand.hbm [shape: f32[8,10], index: 3, kind: output, shape index: {}]  }
   0x1   :  { %v737_v0 = vld [vmem:[%s1006_s1 + $0x78] sm:$0xff]   ;;  %v741_v4 = vld [vmem:[%s1006_s1 + $0x70] sm:$0xff]   ;;  %v745_v8 = vld [vmem:[%s1006_s1 + $0x68] sm:$0xff]  }
   0x2   :  { %v738_v1 = vld [vmem:[%s1006_s1 + $0x38] sm:$0xff]   ;;  %660 = vmatprep.subr.bf16.mxu0 %v737_v0  ;;  %v742_v5 = vld [vmem:[%s1006_s1 + $0x30] sm:$0xff]   ;;  %v746_v9 = vld [vmem:[%s1006_s1 + $0x28] sm:$0xff]  }
   0x3   :  { %v739_v2 = vld [vmem:[%s1006_s1 + $0xf8] sm:$0xff]   ;;  %661 = vmatpush3.bf16.msra.mxu0 %v738_v1  ;;  %v743_v6 = vld [vmem:[%s1006_s1 + $0xf0] sm:$0xff]   ;;  %v747_v10 = vld [vmem:[%s1006_s1 + $0xe8] sm:$0xff]  }
   0x4   :  { %v740_v3 = vld [vmem:[%s1006_s1 + $0xb8] sm:$0xff]   ;;  %682 = vmatprep.subr.bf16.mxu1 %v739_v2  ;;  %662 = vmatprep.subr.bf16.mxu0 %v741_v4  ;;  %v744_v7 = vld [vmem:[%s1006_s1 + $0xb0] sm:$0xff]   ;;  %v748_v11 = vld [vmem:[%s1006_s1 + $0xa8] sm:$0xff]  }
   0x5   :  { %683 = vmatpush3.bf16.msra.mxu1 %v740_v3  ;;  %v749_v12 = vld [vmem:[%s1006_s1 + $0x60] sm:$0xff]   ;;  %v753_v16 = vld [vmem:[%s1006_s1 + $0x58] sm:$0xff]   ;;  %v757_v20 = vld [vmem:[%s1006_s1 + $0x50] sm:$0xff]  }
   0x6   :  { %684 = vmatprep.subr.bf16.mxu1 %v743_v6  ;;  %v750_v13 = vld [vmem:[%s1006_s1 + $0x20] sm:$0xff]   ;;  %v754_v17 = vld [vmem:[%s1006_s1 + $0x18] sm:$0xff]   ;;  %v758_v21 = vld [vmem:[%s1006_s1 + $0x10] sm:$0xff]  }
   0x7   :  { %663 = vmatpush3.bf16.msra.mxu0 %v742_v5  ;;  %v751_v14 = vld [vmem:[%s1006_s1 + $0xe0] sm:$0xff]   ;;  %v755_v18 = vld [vmem:[%s1006_s1 + $0xd8] sm:$0xff]   ;;  %v759_v22 = vld [vmem:[%s1006_s1 + $0xd0] sm:$0xff]  }
   0x8   :  { %664 = vmatprep.subr.bf16.mxu0 %v745_v8  ;;  %v752_v15 = vld [vmem:[%s1006_s1 + $0xa0] sm:$0xff]   ;;  %v756_v19 = vld [vmem:[%s1006_s1 + $0x98] sm:$0xff]   ;;  %v760_v23 = vld [vmem:[%s1006_s1 + $0x90] sm:$0xff]  }
   0x9   :  { %685 = vmatpush3.bf16.msra.mxu1 %v744_v7  ;;  %v761_v24 = vld [vmem:[%s1006_s1 + $0x48] sm:$0xff]   ;;  %v765_v28 = vld [vmem:[%s1006_s1 + $0x40] sm:$0xff]   ;;  %v769_v36 = vld [vmem:[%s1006_s1 + $0x178] sm:$0xff]  }
   0xa   :  { %686 = vmatprep.subr.bf16.mxu1 %v747_v10  ;;  %v762_v25 = vld [vmem:[%s1006_s1 + $0x8] sm:$0xff]   ;;  %v766_v29 = vld [vmem:[%s1006_s1] sm:$0xff]   ;;  %v19_v37 = vld [vmem:[%s1005_s0 + $0x18] sm:$0xff] }
   0xb   :  { %665 = vmatpush3.bf16.msra.mxu0 %v746_v9  ;;  %v763_v26 = vld [vmem:[%s1006_s1 + $0xc8] sm:$0xff]   ;;  %v767_v30 = vld [vmem:[%s1006_s1 + $0xc0] sm:$0xff]   ;;  %v26_v38 = vpack.c.bf16 %v19_v37, %v19_v37  ;;  %v770_v39 = vld [vmem:[%s1006_s1 + $0x138] sm:$0xff]  }
   0xc   :  { %666 = vmatprep.subr.bf16.mxu0 %v749_v12  ;;  %v764_v27 = vld [vmem:[%s1006_s1 + $0x88] sm:$0xff]   ;;  %v768_v33 = vld [vmem:[%s1006_s1 + $0x80] sm:$0xff]   ;;  %v18_v40 = vld [vmem:[%s1005_s0 + $0x10] sm:$0xff] }
   0xd   :  { %687 = vmatpush3.bf16.msra.mxu1 %v748_v11  ;;  %v17_v31 = vld [vmem:[%s1005_s0 + $0x8] sm:$0xff]  ;;  %v16_v34 = vld [vmem:[%s1005_s0] sm:$0xff]  ;;  %505 = vmatprep.mubr.bf16.mxu1 %v26_v38  ;;  %v25_v41 = vpack.c.bf16 %v18_v40, %v18_v40  ;;  %v771_v42 = vld [vmem:[%s1006_s1 + $0x170] sm:$0xff]  }
   0xe   :  { %688 = vmatprep.subr.bf16.mxu1 %v751_v14  ;;  %v24_v32 = vpack.c.bf16 %v17_v31, %v17_v31  ;;  %v23_v35 = vpack.c.bf16 %v16_v34, %v16_v34  ;;  %v772_v43 = vld [vmem:[%s1006_s1 + $0x130] sm:$0xff]   ;;  %v773_v45 = vld [vmem:[%s1006_s1 + $0x168] sm:$0xff]   ;;  %v775_v47 = vld [vmem:[%s1006_s1 + $0x160] sm:$0xff]  }
   0xf   :  { %667 = vmatpush3.bf16.msra.mxu0 %v750_v13  ;;  %v774_v46 = vld [vmem:[%s1006_s1 + $0x128] sm:$0xff]   ;;  %v776_v48 = vld [vmem:[%s1006_s1 + $0x120] sm:$0xff]   ;;  %v777_v49 = vld [vmem:[%s1006_s1 + $0x158] sm:$0xff]  }
  0x10   :  { %668 = vmatprep.subr.bf16.mxu0 %v753_v16  ;;  %465 = vmatprep.mubr.bf16.mxu0 %v24_v32  ;;  %v778_v50 = vld [vmem:[%s1006_s1 + $0x118] sm:$0xff]   ;;  %v783_v51 = vld [vmem:[%s1006_s1 + $0x180] sm:$0xff]   ;;  %v779_v52 = vld [vmem:[%s1006_s1 + $0x150] sm:$0xff]  }
  0x11   :  { %689 = vmatpush3.bf16.msra.mxu1 %v752_v15  ;;  %v22_v53 = vld [vmem:[%s1005_s0 + $0x30] sm:$0xff]  ;;  %v21_v54 = vld [vmem:[%s1005_s0 + $0x28] sm:$0xff] }
  0x12   :  { %690 = vmatprep.subr.bf16.mxu1 %v755_v18  ;;  %v29_v55 = vpack.c.bf16 %v22_v53, %v22_v53  ;;  %v28_v56 = vpack.c.bf16 %v21_v54, %v21_v54 }
  0x13   :  { %669 = vmatpush3.bf16.msra.mxu0 %v754_v17 }
  0x14   :  { %670 = vmatprep.subr.bf16.mxu0 %v757_v20 }
  0x15   :  { %691 = vmatpush3.bf16.msra.mxu1 %v756_v19 }
  0x16   :  { %692 = vmatprep.subr.bf16.mxu1 %v759_v22 }
  0x17   :  { %671 = vmatpush3.bf16.msra.mxu0 %v758_v21 }
  0x18   :  { %672 = vmatprep.subr.bf16.mxu0 %v761_v24 }
  0x19   :  { %693 = vmatpush3.bf16.msra.mxu1 %v760_v23 }
  0x1a   :  { %694 = vmatprep.subr.bf16.mxu1 %v763_v26 }
  0x1b   :  { %673 = vmatpush3.bf16.msra.mxu0 %v762_v25 }
  0x1c   :  { %674 = vmatprep.subr.bf16.mxu0 %v765_v28 }
  0x1d   :  { %695 = vmatpush3.bf16.msra.mxu1 %v764_v27 }
  0x1e   :  { %696 = vmatprep.subr.bf16.mxu1 %v767_v30 }
  0x1f   :  { %675 = vmatpush3.bf16.msra.mxu0 %v766_v29 }
  0x20   :  { %704 = vmatprep.subr.bf16.mxu0 %v769_v36 }
  0x21   :  { %697 = vmatpush3.bf16.msra.mxu1 %v768_v33 }
  0x22   :  { %466 = vmatmul.mubr.bf16.vlgmr.msra.gmra.mxu0 %v23_v35  ;;  %728 = vmatprep.subr.bf16.mxu1 %v808_v44 }
  0x23   :  { %705 = vmatpush3.bf16.msra.mxu0 %v770_v39 }
  0x24   :  { %506 = vmatmul.mubr.bf16.vlgmr.msra.gmra.mxu1 %v25_v41  ;;  %706 = vmatprep.subr.bf16.mxu0 %v771_v42 }
  0x25   :  { %730 = vmatprep.mubr.msk.bf16.mxu1 %vm809_vm0, %v808_v44  ;;  %729 = vmatpush3.bf16.msra.mxu1 %v783_v51 }
  0x27   :  { %707 = vmatpush3.bf16.msra.mxu0 %v772_v43 }
  0x28   :  { %708 = vmatprep.subr.bf16.mxu0 %v773_v45 }
  0x2b   :  { %709 = vmatpush3.bf16.msra.mxu0 %v774_v46 }
  0x2c   :  { %710 = vmatprep.subr.bf16.mxu0 %v775_v47 }
  0x2f   :  { %711 = vmatpush3.bf16.msra.mxu0 %v776_v48 }
  0x30   :  { %712 = vmatprep.subr.bf16.mxu0 %v777_v49 }
  0x31   :  { %8 = vsyncpa [#allocation3], 0  ;;  %v780_v57 = vld [vmem:[%s1006_s1 + $0x110] sm:$0xff]   ;;  %v781_v58 = vld [vmem:[%s1006_s1 + $0x148] sm:$0xff]   ;;  %731 = vmatmul.mubr.msk.bf16.vlgmr.msra.gmra.mxu1 %vm429_vm1, %v29_v55  ;;  %545 = vmatprep.mubr.bf16.mxu0 %v28_v56  ;;  %vm593_vm2 = vcmask 80896  }
  0x32   :  { %v782_v59 = vld [vmem:[%s1006_s1 + $0x108] sm:$0xff]   ;;  %v784_v60 = vld [vmem:[%s1006_s1 + $0x140] sm:$0xff]  }
  0x33   :  { %713 = vmatpush3.bf16.msra.mxu0 %v778_v50  ;;  %v785_v61 = vld [vmem:[%s1006_s1 + $0x100] sm:$0xff]  }
  0x34   :  { %714 = vmatprep.subr.bf16.mxu0 %v779_v52  ;;  %v20_v62 = vld [vmem:[%s1005_s0 + $0x20] sm:$0xff]  ;;  %s810_s0 = smov [#allocation2]  }
  0x35   :  { %v27_v63 = vpack.c.bf16 %v20_v62, %v20_v62  ;;  %v609_v13 = vld [vmem:[%s1007_s2] ss:$0 sm:$0xff]  ;;  %s601_s17 = sshll.u32 %s810_s0, 4  ;;  %s602_s17 = int_to_ptr.vmem [resolvable:$true] %s601_s17 }
  0x36   :  { %s786_s18 = scalar_lea.vmem %s602_s17, 128  ;;  %p791_p1 = scmp.lt.s32.totalorder %s602_s17, %s602_s17 }
  0x37   :  { %715 = vmatpush3.bf16.msra.mxu0 %v780_v57  ;;  %p787_p0 = scmp.ne.s32.totalorder %s602_s17, %s786_s18  ;;  %p792_p2 = scmp.lt.s32.totalorder %s786_s18, %s786_s18 }
  0x38   :  { %716 = vmatprep.subr.bf16.mxu0 %v781_v58 }
  0x39   :  { %p793_p3 = por %p792_p2, %p791_p1 }
  0x3b   :  { %717 = vmatpush3.bf16.msra.mxu0 %v782_v59  ;;  %p794_p4 = pnand %p793_p3, %p787_p0 }
  0x3c   :  { %718 = vmatprep.subr.bf16.mxu0 %v784_v60 }
  0x3f   :  { %719 = vmatpush3.bf16.msra.mxu0 %v785_v61 }
  0x42   :  { %546 = vmatmul.mubr.bf16.vlgmr.msra.gmra.mxu0 %v27_v63 }
  0xe2   :  { %v676_v0 = vpop.f32.mrf.mxu0 }
  0xe4   :  { %v677_v1 = vpop.f32.mrf.mxu0  ;;  %v698_v2 = vpop.f32.mrf.mxu1 }
  0xe5   :  { %v678_v12 = vadd.f32 %v677_v1, %v676_v0 }
  0xe6   :  { %v679_v3 = vpop.f32.mrf.mxu0  ;;  %v699_v4 = vpop.f32.mrf.mxu1 }
  0xe7   :  { %v468_v14 = vadd.f32 %v678_v12, %v609_v13  ;;  %v700_v15 = vadd.f32 %v699_v4, %v698_v2 }
  0xe8   :  { %v680_v5 = vpop.f32.mrf.mxu0  ;;  %v701_v6 = vpop.f32.mrf.mxu1 }
  0xe9   :  { %v508_v18 = vadd.f32 %v700_v15, %v468_v14 }
  0xea   :  { %v702_v7 = vpop.f32.mrf.mxu1 }
  0xf1   :  { %v587_v8 = vpop.f32.mrf.mxu1 }
  0xf3   :  { %v732_v9 = vpop.f32.mrf.mxu1 }
  0xf5   :  { %v590_v10 = vpop.f32.mrf.mxu1 }
  0xf7   :  { %v733_v11 = vpop.f32.mrf.mxu1 }
 0x102   :  { %v720_v16 = vpop.f32.mrf.mxu0 }
 0x104   :  { %v721_v17 = vpop.f32.mrf.mxu0 }
 0x105   :  { %v722_v19 = vadd.f32 %v721_v17, %v720_v16 }
 0x106   :  { %v723_v20 = vpop.f32.mrf.mxu0 }
 0x107   :  { %v548_v21 = vadd.f32 %v722_v19, %v508_v18 }
 0x108   :  { %v724_v22 = vpop.f32.mrf.mxu0 }
 0x109   :  { %v588_v23 = vadd.f32 %v587_v8, %v548_v21 }
 0x10b   :  { %594 = vst.msk [vmem:[#allocation2] sm:$0xff] %vm593_vm2, %v588_v23 }
 0x10c   :  { %797 = shalt.err (!%p794_p4)
}
 0x10d   :  { %604 = dma.vmem_to_hbm [thread:$0]  %s602_s17, 128, %s1008_s3, [#allocation3]  }
 0x10e   :  { %806 = dma.done.wait [#allocation3], 128  }
 0x10f   :  { %807 = vsyncadd [#allocation3], 4294967168 }
 0x110   :  { %608 = vsyncpa [#allocation3], 1 }

</bundles_post_ra>
